<compile_context>
chip_gen: v5e
topology: v5e:2x2
jax: 0.10.0
libtpu: 0.0.40
codegen_flags: <defaults>
</compile_context>

<pallas_src>
import functools

import jax
import jax.numpy as jnp
from jax.experimental import pallas as pl
from jax.experimental.pallas import tpu as pltpu

_LANE = 128   # vreg lane width (last dim)
_SUBLANE = 8  # f32 sublane quantum (second-to-last dim)


def _round_up(n, m):
    return ((n + m - 1) // m) * m


def _mlp_kernel(*refs, num_layers, act):
    """Fused MLP on one (tm, F0) tile of rows.

    refs = (x_ref, w0_ref, b0_ref, w1_ref, b1_ref, ..., o_ref)
    Weights are bf16; matmuls accumulate in f32; bias/activation stay f32.
    The layer loop is unrolled at trace time.
    """
    x_ref = refs[0]
    o_ref = refs[-1]
    wb_refs = refs[1:-1]

    h = x_ref[...]                                    # f32 (tm, F0)
    for layer in range(num_layers):
        w = wb_refs[2 * layer][...]                   # bf16 (K, N)
        b = wb_refs[2 * layer + 1][...]               # f32  (1, N) -> broadcasts
        h = jnp.dot(h.astype(jnp.bfloat16), w,
                    preferred_element_type=jnp.float32) + b
        if layer < num_layers - 1:                    # output layer: no activation
            if act == "relu":
                h = jnp.maximum(h, 0.0)
            elif act == "tanh":
                h = jnp.tanh(h)
            else:
                raise ValueError(f"unknown activation: {act}")
    o_ref[...] = h.astype(o_ref.dtype)


def prepare_params(params, n_features):
    """Pad + cast parameters ONCE (hoisted out of the per-call forward path).

    params: list of (w, b) with w: (in, out) f32, b: (1, out) f32.
    Returns (padded_wb, dims, pdims) where padded_wb interleaves bf16 weights
    and f32 biases, zero-padded so padded lanes stay exactly 0 through
    relu/tanh.
    """
    dims = [n_features] + [w.shape[1] for (w, _b) in params]
    # First-layer K axis is only ever a sublane axis -> pad to 8.
    # All lane axes (layer outputs / inter-layer dims / final output) -> 128.
    pdims = [_round_up(dims[0], _SUBLANE)] + [_round_up(d, _LANE) for d in dims[1:]]
    padded_wb = []
    for i, (w, b) in enumerate(params):
        w_p = (jnp.zeros((pdims[i], pdims[i + 1]), jnp.bfloat16)
               .at[: w.shape[0], : w.shape[1]].set(w.astype(jnp.bfloat16)))
        b_p = (jnp.zeros((1, pdims[i + 1]), jnp.float32)
               .at[:, : b.shape[1]].set(b))
        padded_wb += [w_p, b_p]
    return padded_wb, dims, pdims


def mlp_forward(x, prepared, activation, *, tm=256):
    """Inference-mode MLP forward.

    x: (B, n_features) f32
    prepared: output of prepare_params()
    activation: "relu" | "tanh"
    Returns (B, n_classes) f32.
    """
    padded_wb, dims, pdims = prepared
    B, F = x.shape
    num_layers = len(dims) - 1

    Bp = _round_up(B, _SUBLANE)
    tm = min(tm, Bp)
    Bp = _round_up(Bp, tm)  # make the batch grid divide evenly

    # Per-call input padding (tiny compared to the weights).
    x_p = jnp.zeros((Bp, pdims[0]), jnp.float32).at[:B, :F].set(x)

    # --- BlockSpecs: x/out tiled over batch; weights/bias fully resident ----
    resident = pl.Buffered(1)  # constant index_map -> second buffer is waste
    in_specs = [pl.BlockSpec((tm, pdims[0]), lambda i: (i, 0))]
    for li in range(num_layers):
        in_specs.append(pl.BlockSpec((pdims[li], pdims[li + 1]),
                                     lambda i: (0, 0), pipeline_mode=resident))
        in_specs.append(pl.BlockSpec((1, pdims[li + 1]),
                                     lambda i: (0, 0), pipeline_mode=resident))
    out_spec = pl.BlockSpec((tm, pdims[-1]), lambda i: (i, 0))

    # --- VMEM budget: bf16 weights + f32 biases (single-buffered) +
    #     double-buffered f32 x/out tiles, with headroom ---------------------
    weight_bytes = sum(pdims[i] * pdims[i + 1] * 2 for i in range(num_layers))
    bias_bytes = sum(pdims[i + 1] * 4 for i in range(num_layers))
    act_bytes = 2 * tm * (pdims[0] + pdims[-1]) * 4
    vmem_limit = min(int(1.25 * (weight_bytes + bias_bytes + act_bytes)) + (8 << 20),
                     112 << 20)
    # TODO(synk): if weight_bytes ever exceeds ~48 MiB (v7x has only 64 MiB
    # VMEM), switch to a per-layer K-tiled grid with a VMEM f32 accumulator
    # instead of this fully weight-resident layout.

    flops = 2 * Bp * sum(pdims[i] * pdims[i + 1] for i in range(num_layers))
    transcendentals = Bp * sum(pdims[1:-1]) if activation == "tanh" else 0
    bytes_accessed = (Bp * pdims[0] * 4 + Bp * pdims[-1] * 4
                      + weight_bytes + bias_bytes)

    kernel = functools.partial(_mlp_kernel, num_layers=num_layers, act=activation)

    out_p = pl.pallas_call(
        kernel,
        out_shape=jax.ShapeDtypeStruct((Bp, pdims[-1]), jnp.float32),
        grid_spec=pl.GridSpec(
            grid=(Bp // tm,),
            in_specs=in_specs,
            out_specs=out_spec,
        ),
        compiler_params=pltpu.CompilerParams(
            dimension_semantics=("parallel",),  # batch rows shard across TCs on v7x
            vmem_limit_bytes=vmem_limit,
        ),
        cost_estimate=pl.CostEstimate(
            flops=int(flops),
            transcendentals=int(transcendentals),
            bytes_accessed=int(bytes_accessed),
        ),
    )(x_p, *padded_wb)

    # Strip padding back to the logical shape.
    return out_p[:B, : dims[-1]]


def init_mlp_params(key, n_features, n_hidden, n_classes):
    """Deterministic nn.Linear-style init: U(-1/sqrt(fan_in), 1/sqrt(fan_in))."""
    dims = [n_features] + list(n_hidden) + [n_classes]
    params = []
    for i in range(len(dims) - 1):
        fan_in, fan_out = dims[i], dims[i + 1]
        key, kw, kb = jax.random.split(key, 3)
        bound = 1.0 / jnp.sqrt(jnp.float32(fan_in))
        # Stored as (in, out); equivalent to PyTorch weight.T
        w = jax.random.uniform(kw, (fan_in, fan_out), jnp.float32, -bound, bound)
        b = jax.random.uniform(kb, (1, fan_out), jnp.float32, -bound, bound)
        params.append((w, b))
    return params


def _reference_forward_f32(x, params, activation):
    """Pure-JAX f32 reference (eval mode, dropout = identity)."""
    h = x
    for (w, b) in params[:-1]:
        h = h @ w + b
        h = jnp.maximum(h, 0.0) if activation == "relu" else jnp.tanh(h)
    w_out, b_out = params[-1]
    return h @ w_out + b_out


def _reference_forward_mixed(x, params, activation):
    """Pure-JAX reference mirroring the kernel's bf16-matmul / f32-accumulate math."""
    h = x
    for i, (w, b) in enumerate(params):
        h = jnp.dot(h.astype(jnp.bfloat16), w.astype(jnp.bfloat16),
                    preferred_element_type=jnp.float32) + b
        if i < len(params) - 1:
            h = jnp.maximum(h, 0.0) if activation == "relu" else jnp.tanh(h)
    return h


if __name__ == "__main__":
    # Small shapes consistent with the module's forward signature.
    batch = 8
    n_features = 16
    n_hidden = [32, 32]
    n_classes = 4

    key = jax.random.PRNGKey(0)
    key_x, key_p = jax.random.split(key)
    x = jax.random.normal(key_x, (batch, n_features), jnp.float32)
    params = init_mlp_params(key_p, n_features, n_hidden, n_classes)

    # Padding + bf16 cast hoisted out of the forward path (done once).
    prepared = prepare_params(params, n_features)

    ok = True
    for activation in ("relu", "tanh"):
        out = mlp_forward(x, prepared, activation)
        out = jax.block_until_ready(out)
        ref_mixed = _reference_forward_mixed(x, params, activation)
        ref_f32 = _reference_forward_f32(x, params, activation)
        ok &= out.shape == (batch, n_classes)
        # Exact-math check against the same mixed-precision recipe ...
        ok &= bool(jnp.allclose(out, ref_mixed, atol=1e-3, rtol=1e-3))
        # ... and loose check against the full-f32 reference (bf16 matmul error).
        ok &= bool(jnp.allclose(out, ref_f32, atol=3e-2, rtol=3e-2))

    # TODO(synk): training-time dropout / loss / optimizer from the PyTorch
    # module are out of scope for a forward-pass kernel.
    if ok:
        print("KERNEL_OK")
</pallas_src>

<mosaic_0001>
module attributes {stable_mosaic.version = 11 : i64} {
  func.func @_mlp_kernel(%arg0: i32, %arg1: memref<8x16xf32, #tpu.memory_space<vmem>>, %arg2: memref<16x128xbf16, #tpu.memory_space<vmem>>, %arg3: memref<1x128xf32, #tpu.memory_space<vmem>>, %arg4: memref<128x128xbf16, #tpu.memory_space<vmem>>, %arg5: memref<1x128xf32, #tpu.memory_space<vmem>>, %arg6: memref<128x128xbf16, #tpu.memory_space<vmem>>, %arg7: memref<1x128xf32, #tpu.memory_space<vmem>>, %arg8: memref<8x128xf32, #tpu.memory_space<vmem>>) attributes {dimension_semantics = [#tpu.dimension_semantics<parallel>], iteration_bounds = array<i64: 1>, scalar_prefetch = 0 : i64, scratch_operands = 0 : i64, tpu.core_type = #tpu.core_type<tc>, window_params = [{transform_indices = @transform_0, window_bounds = array<i64: 8, 16>}, {pipeline_mode = #tpu.pipeline_mode<synchronous>, transform_indices = @transform_1, window_bounds = array<i64: 16, 128>}, {pipeline_mode = #tpu.pipeline_mode<synchronous>, transform_indices = @transform_2, window_bounds = array<i64: 1, 128>}, {pipeline_mode = #tpu.pipeline_mode<synchronous>, transform_indices = @transform_3, window_bounds = array<i64: 128, 128>}, {pipeline_mode = #tpu.pipeline_mode<synchronous>, transform_indices = @transform_4, window_bounds = array<i64: 1, 128>}, {pipeline_mode = #tpu.pipeline_mode<synchronous>, transform_indices = @transform_5, window_bounds = array<i64: 128, 128>}, {pipeline_mode = #tpu.pipeline_mode<synchronous>, transform_indices = @transform_6, window_bounds = array<i64: 1, 128>}, {transform_indices = @transform_7, window_bounds = array<i64: 8, 128>}]} {
    %c0 = arith.constant 0 : index
    %c0_0 = arith.constant 0 : index
    %0 = vector.load %arg1[%c0, %c0_0] : memref<8x16xf32, #tpu.memory_space<vmem>>, vector<8x16xf32>
    %c0_1 = arith.constant 0 : index
    %c0_2 = arith.constant 0 : index
    %1 = vector.load %arg2[%c0_1, %c0_2] : memref<16x128xbf16, #tpu.memory_space<vmem>>, vector<16x128xbf16>
    %c0_3 = arith.constant 0 : index
    %c0_4 = arith.constant 0 : index
    %2 = vector.load %arg3[%c0_3, %c0_4] : memref<1x128xf32, #tpu.memory_space<vmem>>, vector<1x128xf32>
    %3 = arith.truncf %0 : vector<8x16xf32> to vector<8x16xbf16>
    %cst = arith.constant dense<0.000000e+00> : vector<8x128xf32>
    %4 = tpu.matmul %3, %1, %cst {dimension_numbers = #tpu.dot_dimension_numbers<[1], [0], [0], [1], [0, 0, 1, 1], [], []>} : vector<8x16xbf16>, vector<16x128xbf16>, vector<8x128xf32> -> vector<8x128xf32>
    %5 = vector.broadcast %2 : vector<1x128xf32> to vector<8x128xf32>
    %6 = arith.addf %4, %5 : vector<8x128xf32>
    %cst_5 = arith.constant 0.000000e+00 : f32
    %7 = vector.broadcast %cst_5 : f32 to vector<8x128xf32>
    %8 = arith.maximumf %6, %7 : vector<8x128xf32>
    %c0_6 = arith.constant 0 : index
    %c0_7 = arith.constant 0 : index
    %9 = vector.load %arg4[%c0_6, %c0_7] : memref<128x128xbf16, #tpu.memory_space<vmem>>, vector<128x128xbf16>
    %c0_8 = arith.constant 0 : index
    %c0_9 = arith.constant 0 : index
    %10 = vector.load %arg5[%c0_8, %c0_9] : memref<1x128xf32, #tpu.memory_space<vmem>>, vector<1x128xf32>
    %11 = arith.truncf %8 : vector<8x128xf32> to vector<8x128xbf16>
    %cst_10 = arith.constant dense<0.000000e+00> : vector<8x128xf32>
    %12 = tpu.matmul %11, %9, %cst_10 {dimension_numbers = #tpu.dot_dimension_numbers<[1], [0], [0], [1], [0, 0, 1, 1], [], []>} : vector<8x128xbf16>, vector<128x128xbf16>, vector<8x128xf32> -> vector<8x128xf32>
    %13 = vector.broadcast %10 : vector<1x128xf32> to vector<8x128xf32>
    %14 = arith.addf %12, %13 : vector<8x128xf32>
    %cst_11 = arith.constant 0.000000e+00 : f32
    %15 = vector.broadcast %cst_11 : f32 to vector<8x128xf32>
    %16 = arith.maximumf %14, %15 : vector<8x128xf32>
    %c0_12 = arith.constant 0 : index
    %c0_13 = arith.constant 0 : index
    %17 = vector.load %arg6[%c0_12, %c0_13] : memref<128x128xbf16, #tpu.memory_space<vmem>>, vector<128x128xbf16>
    %c0_14 = arith.constant 0 : index
    %c0_15 = arith.constant 0 : index
    %18 = vector.load %arg7[%c0_14, %c0_15] : memref<1x128xf32, #tpu.memory_space<vmem>>, vector<1x128xf32>
    %19 = arith.truncf %16 : vector<8x128xf32> to vector<8x128xbf16>
    %cst_16 = arith.constant dense<0.000000e+00> : vector<8x128xf32>
    %20 = tpu.matmul %19, %17, %cst_16 {dimension_numbers = #tpu.dot_dimension_numbers<[1], [0], [0], [1], [0, 0, 1, 1], [], []>} : vector<8x128xbf16>, vector<128x128xbf16>, vector<8x128xf32> -> vector<8x128xf32>
    %21 = vector.broadcast %18 : vector<1x128xf32> to vector<8x128xf32>
    %22 = arith.addf %20, %21 : vector<8x128xf32>
    %c0_17 = arith.constant 0 : index
    %c0_18 = arith.constant 0 : index
    %23 = vector.load %arg8[%c0_17, %c0_18] : memref<8x128xf32, #tpu.memory_space<vmem>>, vector<8x128xf32>
    tpu.vector_store %arg8[%c0_17, %c0_18], %22 {strides = array<i32>} : memref<8x128xf32, #tpu.memory_space<vmem>>, vector<8x128xf32>,
    return
  }
  func.func @transform_0(%arg0: i32) -> (i32, i32) {
    %c0_i32 = arith.constant 0 : i32
    %c0_i32_0 = arith.constant 0 : i32
    return %arg0, %c0_i32 : i32, i32
  }
  func.func @transform_1(%arg0: i32) -> (i32, i32) {
    %c0_i32 = arith.constant 0 : i32
    %c0_i32_0 = arith.constant 0 : i32
    %c0_i32_1 = arith.constant 0 : i32
    return %c0_i32, %c0_i32_0 : i32, i32
  }
  func.func @transform_2(%arg0: i32) -> (i32, i32) {
    %c0_i32 = arith.constant 0 : i32
    %c0_i32_0 = arith.constant 0 : i32
    %c0_i32_1 = arith.constant 0 : i32
    return %c0_i32, %c0_i32_0 : i32, i32
  }
  func.func @transform_3(%arg0: i32) -> (i32, i32) {
    %c0_i32 = arith.constant 0 : i32
    %c0_i32_0 = arith.constant 0 : i32
    %c0_i32_1 = arith.constant 0 : i32
    return %c0_i32, %c0_i32_0 : i32, i32
  }
  func.func @transform_4(%arg0: i32) -> (i32, i32) {
    %c0_i32 = arith.constant 0 : i32
    %c0_i32_0 = arith.constant 0 : i32
    %c0_i32_1 = arith.constant 0 : i32
    return %c0_i32, %c0_i32_0 : i32, i32
  }
  func.func @transform_5(%arg0: i32) -> (i32, i32) {
    %c0_i32 = arith.constant 0 : i32
    %c0_i32_0 = arith.constant 0 : i32
    %c0_i32_1 = arith.constant 0 : i32
    return %c0_i32, %c0_i32_0 : i32, i32
  }
  func.func @transform_6(%arg0: i32) -> (i32, i32) {
    %c0_i32 = arith.constant 0 : i32
    %c0_i32_0 = arith.constant 0 : i32
    %c0_i32_1 = arith.constant 0 : i32
    return %c0_i32, %c0_i32_0 : i32, i32
  }
  func.func @transform_7(%arg0: i32) -> (i32, i32) {
    %c0_i32 = arith.constant 0 : i32
    %c0_i32_0 = arith.constant 0 : i32
    return %arg0, %c0_i32 : i32, i32
  }
}

</mosaic_0001>

<bundles_post_ra>
// kernel: tpu_custom_call.1
= control target key start
LH: loop header
LB: loop body
LE: loop exit
PB: predicated region body
PF: predicated region fallthrough
CT: control target
= control target key end

     0   :  { %12 = vsyncpa [#allocation3], 0  ;;  %s601_s0 = inlined_call_operand.hbm [shape: f32[8,16], index: 0, kind: input, shape index: {}]   ;;  %s602_s1 = inlined_call_operand.hbm [shape: bf16[16,128], index: 1, kind: input, shape index: {}]   ;;  %s603_s2 = inlined_call_operand.vmem [shape: f32[1,128], index: 2, kind: input, shape index: {}]   ;;  %s604_s3 = inlined_call_operand.hbm [shape: bf16[128,128], index: 3, kind: input, shape index: {}]   ;;  %s605_s4 = inlined_call_operand.vmem [shape: f32[1,128], index: 4, kind: input, shape index: {}]   ;;  %s606_s5 = inlined_call_operand.hbm [shape: bf16[128,128], index: 5, kind: input, shape index: {}]   ;;  %s607_s6 = inlined_call_operand.vmem [shape: f32[1,128], index: 6, kind: input, shape index: {}]   ;;  %s608_s7 = inlined_call_operand.hbm [shape: f32[8,128], index: 7, kind: output, shape index: {}]  }
   0x1   :  { %13 = vsyncpa [#allocation6], 0 }
   0x2   :  { %14 = vsyncpa [#allocation9], 0  ;;  %s31_s26 = sshll.u32 %s602_s1, 4  ;;  %s32_s26 = int_to_ptr.hbm [resolvable:$true] %s31_s26 }
   0x3   :  { %15 = vsyncpa [#allocation4], 0  ;;  %s530_s27 = smov [#allocation5]   ;;  %s21_s8 = sshll.u32 %s601_s0, 4  ;;  %s22_s8 = int_to_ptr.hbm [resolvable:$true] %s21_s8 }
   0x4   :  { %s33_s28 = sshll.u32 %s530_s27, 4  ;;  %s531_s9 = smov 64   ;;  %s34_s28 = int_to_ptr.vmem [resolvable:$true] %s33_s28 }
   0x5   :  { %s532_s10 = smov 4   ;;  %s533_s11 = smov [#allocation2]  }
   0x6   :  { %39 = dma.hbm_to_vmem [thread:$0]  %s32_s26, 128, %s34_s28, [#allocation6], %s531_s9, %s531_s9, %s532_s10  }
   0x7   :  { %s23_s12 = sshll.u32 %s533_s11, 4  ;;  %s46_s15 = sshll.u32 %s604_s3, 4  ;;  %s24_s12 = int_to_ptr.vmem [resolvable:$true] %s23_s12  ;;  %s47_s15 = int_to_ptr.hbm [resolvable:$true] %s46_s15 }
   0x8   :  { %26 = dma.hbm_to_vmem [thread:$0]  %s22_s8, 128, %s24_s12, [#allocation3]  }
   0x9   :  { %s61_s17 = sshll.u32 %s606_s5, 4  ;;  %s534_s18 = smov [#allocation7]   ;;  %s62_s17 = int_to_ptr.hbm [resolvable:$true] %s61_s17 }
   0xa   :  { %s48_s19 = sshll.u32 %s534_s18, 4  ;;  %s535_s0 = smov [#allocation8]   ;;  %s49_s19 = int_to_ptr.vmem [resolvable:$true] %s48_s19 }
   0xb   :  { %54 = dma.hbm_to_vmem [thread:$0]  %s47_s15, 1024, %s49_s19, [#allocation6], %s531_s9, %s531_s9, %s532_s10  }
   0xc   :  { %s63_s20 = sshll.u32 %s535_s0, 4  ;;  %s64_s20 = int_to_ptr.vmem [resolvable:$true] %s63_s20 }
   0xd   :  { %69 = dma.hbm_to_vmem [thread:$0]  %s62_s17, 1024, %s64_s20, [#allocation9], %s531_s9, %s531_s9, %s532_s10  }
   0xe   :  { %522 = dma.done.wait [#allocation3], 128  }
   0xf   :  { %523 = vsyncadd [#allocation3], 4294967168 }
  0x10   :  { %524 = dma.done.wait [#allocation6], 1152  }
  0x11   :  { %525 = vsyncadd [#allocation6], 4294966144 }
  0x12   :  { %526 = dma.done.wait [#allocation9], 1024  }
  0x13   :  { %527 = vsyncadd [#allocation9], 4294966272  ;;  %v375_v0 = vld [vmem:[#allocation5] sm:$0xff]  ;;  %v89_v1 = vld [vmem:[#allocation2] sm:$0xff]  ;;  %vm103_vm0 = vcmask 130048   ;;  %s536_s24 = smov [#allocation10]  }
  0x14   :  { %v383_v2 = vld [vmem:[#allocation7 + $0x38] sm:$0xff]  ;;  %v93_v3 = vpack.c.bf16 %v89_v1, %v89_v1  ;;  %114 = vmatpush.bf16.msra.mxu0 %v375_v0  ;;  %v382_v4 = vld [vmem:[#allocation7 + $0x30] sm:$0xff]  ;;  %v381_v5 = vld [vmem:[#allocation7 + $0x28] sm:$0xff]  ;;  %s292_s25 = sshll.u32 %s536_s24, 4  ;;  %s294_s28 = sshll.u32 %s608_s7, 4  ;;  %s293_s25 = int_to_ptr.vmem [resolvable:$true] %s292_s25  ;;  %s295_s28 = int_to_ptr.hbm [resolvable:$true] %s294_s28 }
  0x15   :  { %190 = vmatpush.bf16.msra.mxu1 %v383_v2  ;;  %v380_v6 = vld [vmem:[#allocation7 + $0x20] sm:$0xff]  ;;  %v379_v7 = vld [vmem:[#allocation7 + $0x18] sm:$0xff]  ;;  %v378_v8 = vld [vmem:[#allocation7 + $0x10] sm:$0xff] }
  0x16   :  { %v377_v9 = vld [vmem:[#allocation7 + $0x8] sm:$0xff]  ;;  %v376_v10 = vld [vmem:[#allocation7] sm:$0xff]  ;;  %v391_v11 = vld [vmem:[#allocation8 + $0x38] sm:$0xff] }
  0x17   :  { %310 = vmatmul.msk.bf16.vlgmr.msra.gmra.mxu0 %vm103_vm0, %v93_v3  ;;  %273 = vmatpush.bf16.msra.mxu2 %v391_v11  ;;  %v390_v12 = vld [vmem:[#allocation8 + $0x30] sm:$0xff]  ;;  %v389_v13 = vld [vmem:[#allocation8 + $0x28] sm:$0xff]  ;;  %v388_v14 = vld [vmem:[#allocation8 + $0x20] sm:$0xff] }
  0x18   :  { %v387_v15 = vld [vmem:[#allocation8 + $0x18] sm:$0xff]  ;;  %v386_v16 = vld [vmem:[#allocation8 + $0x10] sm:$0xff]  ;;  %v385_v23 = vld [vmem:[#allocation8 + $0x8] sm:$0xff] }
  0x19   :  { %191 = vmatpush.bf16.msra.mxu1 %v382_v4  ;;  %v399_v17 = vld [vmem:[%s603_s2] ss:$0 sm:$0xff]  ;;  %v384_v24 = vld [vmem:[#allocation8] sm:$0xff] }
  0x1a   :  { %v400_v25 = vld [vmem:[%s605_s4] ss:$0 sm:$0xff] }
  0x1b   :  { %274 = vmatpush.bf16.msra.mxu2 %v390_v12  ;;  %v401_v31 = vld [vmem:[%s607_s6] ss:$0 sm:$0xff] }
  0x1d   :  { %192 = vmatpush.bf16.msra.mxu1 %v381_v5 }
  0x1f   :  { %275 = vmatpush.bf16.msra.mxu2 %v389_v13 }
  0x21   :  { %193 = vmatpush.bf16.msra.mxu1 %v380_v6 }
  0x23   :  { %276 = vmatpush.bf16.msra.mxu2 %v388_v14 }
  0x25   :  { %194 = vmatpush.bf16.msra.mxu1 %v379_v7 }
  0x27   :  { %277 = vmatpush.bf16.msra.mxu2 %v387_v15 }
  0x29   :  { %195 = vmatpush.bf16.msra.mxu1 %v378_v8 }
  0x2b   :  { %278 = vmatpush.bf16.msra.mxu2 %v386_v16 }
  0x2d   :  { %196 = vmatpush.bf16.msra.mxu1 %v377_v9 }
  0x2f   :  { %279 = vmatpush.bf16.msra.mxu2 %v385_v23 }
  0x31   :  { %197 = vmatpush.bf16.msra.mxu1 %v376_v10 }
  0x33   :  { %280 = vmatpush.bf16.msra.mxu2 %v384_v24 }
  0x94   :  { %v116_v18 = vpop.f32.mrf.mxu0 }
  0x95   :  { %v117_v19 = vadd.f32 %v399_v17, %v116_v18 }
  0x97   :  { %v120_v20 = vmax.f32 %v117_v19, 0.0 }
  0x99   :  { %v138_v21 = vpack.c.bf16 %v120_v20, %v120_v20 }
  0x9b   :  { %198 = vmatmul.bf16.vlgmr.msra.gmra.mxu1 %v138_v21 }
  0x9c   :  { %v118_v22 = vpop.f32.mrf.mxu0 }
 0x118   :  { %v199_v26 = vpop.f32.mrf.mxu1 }
 0x119   :  { %v200_v27 = vadd.f32 %v400_v25, %v199_v26 }
 0x11b   :  { %v203_v28 = vmax.f32 %v200_v27, 0.0 }
 0x11d   :  { %v221_v29 = vpack.c.bf16 %v203_v28, %v203_v28 }
 0x11f   :  { %281 = vmatmul.bf16.vlgmr.msra.gmra.mxu2 %v221_v29 }
 0x120   :  { %v201_v30 = vpop.f32.mrf.mxu1 }
 0x1a2   :  { %v282_v32 = vpop.f32.mrf.mxu2 }
 0x1a3   :  { %v283_v33 = vadd.f32 %v401_v31, %v282_v32 }
 0x1a5   :  { %286 = vst [vmem:[#allocation10] sm:$0xff] %v283_v33 }
 0x1a6   :  { %297 = dma.vmem_to_hbm [thread:$0]  %s293_s25, 128, %s295_s28, [#allocation4]  }
 0x1aa   :  { %v284_v34 = vpop.f32.mrf.mxu2 }
 0x1ab   :  { %528 = dma.done.wait [#allocation4], 128  }
 0x1ac   :  { %529 = vsyncadd [#allocation4], 4294967168 }
 0x1ad   :  { %302 = vsyncpa [#allocation3], 1 }
 0x1ae   :  { %303 = vsyncpa [#allocation6], 1 }
 0x1af   :  { %304 = vsyncpa [#allocation9], 1 }
 0x1b0   :  { %305 = vsyncpa [#allocation4], 1 }

</bundles_post_ra>
